<compile_context>
chip_gen: v7x
topology: tpu7x:2x2x1
jax: 0.10.0
libtpu: 0.0.40
codegen_flags: <defaults>
</compile_context>

<pallas_src>
import functools

import jax
import jax.numpy as jnp
from jax.experimental import pallas as pl
from jax.experimental.pallas import tpu as pltpu


HIDDEN = 256


def _p_forward_kernel(in_ref, w1_ref, b1_ref, w2_ref, b2_ref,
                      w34_ref, b34_ref, out_ref, *, state_dim, action_dim):
    S = state_dim
    A = action_dim

    inp = in_ref[...]                              # (TB, S+A+S) f32: [state|action|noise]
    st = inp[:, :S]
    sa = inp[:, :S + A]
    noise = inp[:, S + A:]

    cdt = w2_ref.dtype                             # matmul operand dtype (f32 by default)

    # fc1 + relu  (single matmul over the packed [state|action] lanes)
    h1 = jnp.dot(sa.astype(cdt), w1_ref[...],
                 preferred_element_type=jnp.float32) + b1_ref[...]
    h1 = jnp.maximum(h1, 0.0)

    # fc2 + relu
    h2 = jnp.dot(h1.astype(cdt), w2_ref[...],
                 preferred_element_type=jnp.float32) + b2_ref[...]
    h2 = jnp.maximum(h2, 0.0)

    # fused fc3|fc4 head: one (256, 2S) matmul, then split columns
    head = jnp.dot(h2.astype(cdt), w34_ref[...],
                   preferred_element_type=jnp.float32) + b34_ref[...]
    ds = head[:, :S]
    logvar = head[:, S:]

    mu = ds + st
    z = mu + noise * jnp.exp(0.5 * logvar)

    # packed [mu | logvar | z] output via static lane-slice stores (no concat)
    out_ref[:, :S] = mu
    out_ref[:, S:2 * S] = logvar
    out_ref[:, 2 * S:] = z


def init_params(key, state_dim, action_dim, hidden=HIDDEN, weight_dtype=jnp.float32):
    """Xavier-uniform weights (same fan-in/out as the PyTorch module), zero biases.

    Kernel-ready layout: W stored [in, out]; fc3/fc4 fused column-wise.
    """
    def xavier(k, fan_in, fan_out):
        bound = (6.0 / (fan_in + fan_out)) ** 0.5
        return jax.random.uniform(k, (fan_in, fan_out), jnp.float32, -bound, bound)

    k1, k2, k3, k4 = jax.random.split(key, 4)
    w1 = xavier(k1, state_dim + action_dim, hidden)
    w2 = xavier(k2, hidden, hidden)
    w3 = xavier(k3, hidden, state_dim)
    w4 = xavier(k4, hidden, state_dim)
    return {
        "w1": w1.astype(weight_dtype),
        "b1": jnp.zeros((1, hidden), jnp.float32),
        "w2": w2.astype(weight_dtype),
        "b2": jnp.zeros((1, hidden), jnp.float32),
        "w34": jnp.concatenate([w3, w4], axis=-1).astype(weight_dtype),
        "b34": jnp.zeros((1, 2 * state_dim), jnp.float32),
    }


def _choose_batch_tile(B, block_rows):
    """Pick the batch tile: as large as VMEM allows, but keep >=2 grid steps
    for big batches so both v7x TensorCores get work."""
    cap = max(8, (block_rows // 8) * 8)
    if B <= cap:
        tb = B
        if B >= 1024 and (B // 2) % 8 == 0:
            tb = B // 2                     # >= 2 parallel steps on dual-TC chips
        return tb
    return cap


def p_forward_model(params, state, action, noise, *, block_rows=2048):
    """Pallas forward pass. Returns (mu, logvar, sample_z)."""
    state = state.astype(jnp.float32)
    action = action.astype(jnp.float32)
    noise = noise.astype(jnp.float32)
    B, S = state.shape
    A = action.shape[-1]
    H = params["w2"].shape[0]

    # One packed, lane-contiguous input: [state | action | noise]  (B, 2S+A)
    packed_in = jnp.concatenate([state, action, noise], axis=-1)

    TB = _choose_batch_tile(B, block_rows)
    grid = (pl.cdiv(B, TB),)
    # NOTE: if B % TB != 0 the padded rows of the last block may compute
    # exp(garbage); harmless on hardware, rows are discarded on writeback.

    def batch_spec(cols):
        return pl.BlockSpec((TB, cols), lambda i: (i, 0))

    def weight_spec(rows, cols):
        # constant index_map -> block stays VMEM-resident, no re-DMA per step
        return pl.BlockSpec((rows, cols), lambda i: (0, 0))

    kernel = functools.partial(_p_forward_kernel, state_dim=S, action_dim=A)

    packed_out = pl.pallas_call(
        kernel,
        out_shape=jax.ShapeDtypeStruct((B, 3 * S), jnp.float32),
        grid=grid,
        in_specs=[
            batch_spec(2 * S + A),        # packed [state|action|noise]
            weight_spec(S + A, H),        # w1
            weight_spec(1, H),            # b1
            weight_spec(H, H),            # w2
            weight_spec(1, H),            # b2
            weight_spec(H, 2 * S),        # w34 (fused fc3|fc4)
            weight_spec(1, 2 * S),        # b34
        ],
        out_specs=batch_spec(3 * S),
        compiler_params=pltpu.CompilerParams(
            dimension_semantics=("parallel",),
            vmem_limit_bytes=32 * 1024 * 1024),
    )(packed_in,
      params["w1"], params["b1"],
      params["w2"], params["b2"],
      params["w34"], params["b34"])

    mu = packed_out[:, :S]
    logvar = packed_out[:, S:2 * S]
    z = packed_out[:, 2 * S:]
    return mu, logvar, z


def _reference(params, state, action, noise):
    """Pure-JAX reference with the same operand dtypes as the kernel."""
    cdt = params["w2"].dtype
    S = state.shape[-1]
    sa = jnp.concatenate([state, action], axis=-1)
    h1 = jnp.dot(sa.astype(cdt), params["w1"],
                 preferred_element_type=jnp.float32) + params["b1"]
    h1 = jnp.maximum(h1, 0.0)
    h2 = jnp.dot(h1.astype(cdt), params["w2"],
                 preferred_element_type=jnp.float32) + params["b2"]
    h2 = jnp.maximum(h2, 0.0)
    head = jnp.dot(h2.astype(cdt), params["w34"],
                   preferred_element_type=jnp.float32) + params["b34"]
    mu = head[:, :S] + state
    logvar = head[:, S:]
    z = mu + noise * jnp.exp(0.5 * logvar)
    return mu, logvar, z


if __name__ == "__main__":
    state_dim = 8
    action_dim = 8
    batch = 8

    key = jax.random.PRNGKey(0)
    kp, ks, ka, kn = jax.random.split(key, 4)

    params = init_params(kp, state_dim, action_dim)
    state = jax.random.uniform(ks, (batch, state_dim), jnp.float32, -1.0, 1.0)
    action = jax.random.uniform(ka, (batch, action_dim), jnp.float32, -1.0, 1.0)
    # TODO(synk): reference uses torch.randn_like; noise here is drawn with
    # jax.random.normal (same distribution, different stream).
    noise = jax.random.normal(kn, (batch, state_dim), jnp.float32)

    mu, logvar, z = p_forward_model(params, state, action, noise)
    jax.block_until_ready((mu, logvar, z))

    assert mu.shape == (batch, state_dim)
    assert logvar.shape == (batch, state_dim)
    assert z.shape == (batch, state_dim)

    r_mu, r_logvar, r_z = _reference(params, state, action, noise)
    assert jnp.allclose(mu, r_mu, atol=1e-5, rtol=1e-5)
    assert jnp.allclose(logvar, r_logvar, atol=1e-5, rtol=1e-5)
    assert jnp.allclose(z, r_z, atol=1e-5, rtol=1e-5)

    print("KERNEL_OK")
</pallas_src>

<mosaic_0001>
module attributes {stable_mosaic.version = 11 : i64} {
  func.func @_p_forward_kernel(%arg0: i32, %arg1: memref<8x24xf32, #tpu.memory_space<vmem>>, %arg2: memref<16x256xf32, #tpu.memory_space<vmem>>, %arg3: memref<1x256xf32, #tpu.memory_space<vmem>>, %arg4: memref<256x256xf32, #tpu.memory_space<vmem>>, %arg5: memref<1x256xf32, #tpu.memory_space<vmem>>, %arg6: memref<256x16xf32, #tpu.memory_space<vmem>>, %arg7: memref<1x16xf32, #tpu.memory_space<vmem>>, %arg8: memref<8x24xf32, #tpu.memory_space<vmem>>) attributes {dimension_semantics = [#tpu.dimension_semantics<parallel>], iteration_bounds = array<i64: 1>, scalar_prefetch = 0 : i64, scratch_operands = 0 : i64, tpu.core_type = #tpu.core_type<tc>, window_params = [{transform_indices = @transform_0, window_bounds = array<i64: 8, 24>}, {pipeline_mode = #tpu.pipeline_mode<synchronous>, transform_indices = @transform_1, window_bounds = array<i64: 16, 256>}, {pipeline_mode = #tpu.pipeline_mode<synchronous>, transform_indices = @transform_2, window_bounds = array<i64: 1, 256>}, {pipeline_mode = #tpu.pipeline_mode<synchronous>, transform_indices = @transform_3, window_bounds = array<i64: 256, 256>}, {pipeline_mode = #tpu.pipeline_mode<synchronous>, transform_indices = @transform_4, window_bounds = array<i64: 1, 256>}, {pipeline_mode = #tpu.pipeline_mode<synchronous>, transform_indices = @transform_5, window_bounds = array<i64: 256, 16>}, {pipeline_mode = #tpu.pipeline_mode<synchronous>, transform_indices = @transform_6, window_bounds = array<i64: 1, 16>}, {transform_indices = @transform_7, window_bounds = array<i64: 8, 24>}]} {
    %c0 = arith.constant 0 : index
    %c0_0 = arith.constant 0 : index
    %0 = vector.load %arg1[%c0, %c0_0] : memref<8x24xf32, #tpu.memory_space<vmem>>, vector<8x24xf32>
    %1 = vector.extract_strided_slice %0 {offsets = [0, 0], sizes = [8, 8], strides = [1, 1]} : vector<8x24xf32> to vector<8x8xf32>
    %2 = vector.extract_strided_slice %0 {offsets = [0, 0], sizes = [8, 16], strides = [1, 1]} : vector<8x24xf32> to vector<8x16xf32>
    %3 = vector.extract_strided_slice %0 {offsets = [0, 16], sizes = [8, 8], strides = [1, 1]} : vector<8x24xf32> to vector<8x8xf32>
    %c0_1 = arith.constant 0 : index
    %c0_2 = arith.constant 0 : index
    %4 = vector.load %arg2[%c0_1, %c0_2] : memref<16x256xf32, #tpu.memory_space<vmem>>, vector<16x256xf32>
    %cst = arith.constant dense<0.000000e+00> : vector<8x256xf32>
    %5 = tpu.matmul %2, %4, %cst {dimension_numbers = #tpu.dot_dimension_numbers<[1], [0], [0], [1], [0, 0, 1, 1], [], []>} : vector<8x16xf32>, vector<16x256xf32>, vector<8x256xf32> -> vector<8x256xf32>
    %c0_3 = arith.constant 0 : index
    %c0_4 = arith.constant 0 : index
    %6 = vector.load %arg3[%c0_3, %c0_4] : memref<1x256xf32, #tpu.memory_space<vmem>>, vector<1x256xf32>
    %7 = vector.broadcast %6 : vector<1x256xf32> to vector<8x256xf32>
    %8 = arith.addf %5, %7 : vector<8x256xf32>
    %cst_5 = arith.constant 0.000000e+00 : f32
    %9 = vector.broadcast %cst_5 : f32 to vector<8x256xf32>
    %10 = arith.maximumf %8, %9 : vector<8x256xf32>
    %c0_6 = arith.constant 0 : index
    %c0_7 = arith.constant 0 : index
    %11 = vector.load %arg4[%c0_6, %c0_7] : memref<256x256xf32, #tpu.memory_space<vmem>>, vector<256x256xf32>
    %cst_8 = arith.constant dense<0.000000e+00> : vector<8x256xf32>
    %12 = tpu.matmul %10, %11, %cst_8 {dimension_numbers = #tpu.dot_dimension_numbers<[1], [0], [0], [1], [0, 0, 1, 1], [], []>} : vector<8x256xf32>, vector<256x256xf32>, vector<8x256xf32> -> vector<8x256xf32>
    %c0_9 = arith.constant 0 : index
    %c0_10 = arith.constant 0 : index
    %13 = vector.load %arg5[%c0_9, %c0_10] : memref<1x256xf32, #tpu.memory_space<vmem>>, vector<1x256xf32>
    %14 = vector.broadcast %13 : vector<1x256xf32> to vector<8x256xf32>
    %15 = arith.addf %12, %14 : vector<8x256xf32>
    %cst_11 = arith.constant 0.000000e+00 : f32
    %16 = vector.broadcast %cst_11 : f32 to vector<8x256xf32>
    %17 = arith.maximumf %15, %16 : vector<8x256xf32>
    %c0_12 = arith.constant 0 : index
    %c0_13 = arith.constant 0 : index
    %18 = vector.load %arg6[%c0_12, %c0_13] : memref<256x16xf32, #tpu.memory_space<vmem>>, vector<256x16xf32>
    %cst_14 = arith.constant dense<0.000000e+00> : vector<8x16xf32>
    %19 = tpu.matmul %17, %18, %cst_14 {dimension_numbers = #tpu.dot_dimension_numbers<[1], [0], [0], [1], [0, 0, 1, 1], [], []>} : vector<8x256xf32>, vector<256x16xf32>, vector<8x16xf32> -> vector<8x16xf32>
    %c0_15 = arith.constant 0 : index
    %c0_16 = arith.constant 0 : index
    %20 = vector.load %arg7[%c0_15, %c0_16] : memref<1x16xf32, #tpu.memory_space<vmem>>, vector<1x16xf32>
    %21 = vector.broadcast %20 : vector<1x16xf32> to vector<8x16xf32>
    %22 = arith.addf %19, %21 : vector<8x16xf32>
    %23 = vector.extract_strided_slice %22 {offsets = [0, 0], sizes = [8, 8], strides = [1, 1]} : vector<8x16xf32> to vector<8x8xf32>
    %24 = vector.extract_strided_slice %22 {offsets = [0, 8], sizes = [8, 8], strides = [1, 1]} : vector<8x16xf32> to vector<8x8xf32>
    %25 = arith.addf %23, %1 : vector<8x8xf32>
    %cst_17 = arith.constant 5.000000e-01 : f32
    %26 = vector.broadcast %cst_17 : f32 to vector<8x8xf32>
    %27 = arith.mulf %26, %24 : vector<8x8xf32>
    %28 = math.exp %27 : vector<8x8xf32>
    %29 = arith.mulf %3, %28 : vector<8x8xf32>
    %30 = arith.addf %25, %29 : vector<8x8xf32>
    %c0_18 = arith.constant 0 : index
    %c0_19 = arith.constant 0 : index
    %31 = vector.load %arg8[%c0_18, %c0_19] : memref<8x24xf32, #tpu.memory_space<vmem>>, vector<8x8xf32>
    tpu.vector_store %arg8[%c0_18, %c0_19], %25 {strides = array<i32>} : memref<8x24xf32, #tpu.memory_space<vmem>>, vector<8x8xf32>,
    %c0_20 = arith.constant 0 : index
    %c8 = arith.constant 8 : index
    %32 = vector.load %arg8[%c0_20, %c8] : memref<8x24xf32, #tpu.memory_space<vmem>>, vector<8x8xf32>
    tpu.vector_store %arg8[%c0_20, %c8], %24 {strides = array<i32>} : memref<8x24xf32, #tpu.memory_space<vmem>>, vector<8x8xf32>,
    %c0_21 = arith.constant 0 : index
    %c16 = arith.constant 16 : index
    %33 = vector.load %arg8[%c0_21, %c16] : memref<8x24xf32, #tpu.memory_space<vmem>>, vector<8x8xf32>
    tpu.vector_store %arg8[%c0_21, %c16], %30 {strides = array<i32>} : memref<8x24xf32, #tpu.memory_space<vmem>>, vector<8x8xf32>,
    return
  }
  func.func @transform_0(%arg0: i32) -> (i32, i32) {
    %c0_i32 = arith.constant 0 : i32
    %c0_i32_0 = arith.constant 0 : i32
    return %arg0, %c0_i32 : i32, i32
  }
  func.func @transform_1(%arg0: i32) -> (i32, i32) {
    %c0_i32 = arith.constant 0 : i32
    %c0_i32_0 = arith.constant 0 : i32
    %c0_i32_1 = arith.constant 0 : i32
    return %c0_i32, %c0_i32_0 : i32, i32
  }
  func.func @transform_2(%arg0: i32) -> (i32, i32) {
    %c0_i32 = arith.constant 0 : i32
    %c0_i32_0 = arith.constant 0 : i32
    %c0_i32_1 = arith.constant 0 : i32
    return %c0_i32, %c0_i32_0 : i32, i32
  }
  func.func @transform_3(%arg0: i32) -> (i32, i32) {
    %c0_i32 = arith.constant 0 : i32
    %c0_i32_0 = arith.constant 0 : i32
    %c0_i32_1 = arith.constant 0 : i32
    return %c0_i32, %c0_i32_0 : i32, i32
  }
  func.func @transform_4(%arg0: i32) -> (i32, i32) {
    %c0_i32 = arith.constant 0 : i32
    %c0_i32_0 = arith.constant 0 : i32
    %c0_i32_1 = arith.constant 0 : i32
    return %c0_i32, %c0_i32_0 : i32, i32
  }
  func.func @transform_5(%arg0: i32) -> (i32, i32) {
    %c0_i32 = arith.constant 0 : i32
    %c0_i32_0 = arith.constant 0 : i32
    %c0_i32_1 = arith.constant 0 : i32
    return %c0_i32, %c0_i32_0 : i32, i32
  }
  func.func @transform_6(%arg0: i32) -> (i32, i32) {
    %c0_i32 = arith.constant 0 : i32
    %c0_i32_0 = arith.constant 0 : i32
    %c0_i32_1 = arith.constant 0 : i32
    return %c0_i32, %c0_i32_0 : i32, i32
  }
  func.func @transform_7(%arg0: i32) -> (i32, i32) {
    %c0_i32 = arith.constant 0 : i32
    %c0_i32_0 = arith.constant 0 : i32
    return %arg0, %c0_i32 : i32, i32
  }
}

</mosaic_0001>

<bundles_post_ra>
// kernel: tpu_custom_call.1
= control target key start
LH: loop header
LB: loop body
LE: loop exit
PB: predicated region body
PF: predicated region fallthrough
CT: control target
= control target key end

     0   :  { %12 = vsyncpa [#allocation3], 0  ;;  %s824_s0 = inlined_call_operand.vmem [shape: f32[8,24], index: 0, kind: input, shape index: {}]   ;;  %s825_s1 = inlined_call_operand.vmem [shape: f32[16,256], index: 1, kind: input, shape index: {}]   ;;  %s826_s2 = inlined_call_operand.vmem [shape: f32[1,256], index: 2, kind: input, shape index: {}]   ;;  %s827_s3 = inlined_call_operand.hbm [shape: f32[256,256], index: 3, kind: input, shape index: {}]   ;;  %s828_s4 = inlined_call_operand.vmem [shape: f32[1,256], index: 4, kind: input, shape index: {}]   ;;  %s829_s5 = inlined_call_operand.vmem [shape: f32[256,16], index: 5, kind: input, shape index: {}]   ;;  %s830_s6 = inlined_call_operand.vmem [shape: f32[1,16], index: 6, kind: input, shape index: {}]   ;;  %s831_s7 = inlined_call_operand.hbm [shape: f32[8,24], index: 7, kind: output, shape index: {}]  }
   0x1   :  { %13 = vsyncpa [#allocation4], 0  ;;  %s626_s24 = smov [#allocation2]   ;;  %s578_s28 = scalar_lea.hbm %s827_s3, 8192 }
   0x2   :  { %s25_s25 = sshll.u32 %s626_s24, 4  ;;  %p579_p0 = scmp.ne.s32.totalorder %s827_s3, %s578_s28  ;;  %s26_s25 = int_to_ptr.vmem [resolvable:$true] %s25_s25 }
   0x3   :  { %p582_p1 = scmp.lt.u32.totalorder %s578_s28, %s827_s3 }
   0x5   :  { %p584_p2 = pnand %p582_p1, %p579_p0 }
   0x7   :  { %587 = shalt.err (!%p584_p2)
}
   0x8   :  { %s588_s10 = scalar_lea.vmem %s26_s25, 8192  ;;  %p593_p4 = scmp.lt.s32.totalorder %s26_s25, %s26_s25 }
   0x9   :  { %p589_p3 = scmp.ne.s32.totalorder %s26_s25, %s588_s10  ;;  %p594_p5 = scmp.lt.s32.totalorder %s588_s10, %s588_s10 }
   0xb   :  { %p595_p6 = por %p594_p5, %p593_p4 }
   0xd   :  { %p596_p7 = pnand %p595_p6, %p589_p3 }
   0xf   :  { %599 = shalt.err (!%p596_p7)
}
  0x10   :  { %s627_s11 = smov 256   ;;  %s628_s12 = smov 16  }
  0x11   :  { %31 = dma.hbm_to_vmem [thread:$0]  %s827_s3, 8192, %s26_s25, [#allocation3], %s627_s11, %s627_s11, %s628_s12  }
  0x12   :  { %622 = dma.done.wait [#allocation3], 8192  }
  0x13   :  { %623 = vsyncadd [#allocation3], 4294959104  ;;  %v629_v0 = vmov 0.0   ;;  %v43_v1 = vld [vmem:[%s825_s1 + $0x8] sm:$0xff]  ;;  %v45_v2 = vld [vmem:[%s825_s1 + $0x18] sm:$0xff]  ;;  %vm58_vm0 = vcmask 130048  }
  0x14   :  { %126 = vmatprep.mubr.f32.mxu0 %v629_v0  ;;  %v42_v3 = vld [vmem:[%s825_s1] sm:$0xff]  ;;  %v469_v4 = vpack.c.bf16 %v45_v2, %v43_v1  ;;  %v44_v5 = vld [vmem:[%s825_s1 + $0x10] sm:$0xff]  ;;  %v136_v6 = vld [vmem:[#allocation2 + $0x8] sm:$0xff]  ;;  %vm407_vm1 = vcmask 64512   ;;  %vm409_vm2 = vcmask 130112   ;;  %s631_s18 = smov 112  }
  0x15   :  { %v471_v7 = vpack.c.bf16 %v44_v5, %v42_v3  ;;  %v701_v8 = vld [vmem:[%s824_s0] sm:$0xff]  ;;  %v138_v9 = vld [vmem:[#allocation2 + $0x18] sm:$0xff]  ;;  %v137_v11 = vld [vmem:[#allocation2 + $0x10] sm:$0xff]  ;;  %vm415_vm3 = vcmask 195712  }
  0x16   :  { %v135_v10 = vld [vmem:[#allocation2] sm:$0xff]  ;;  %470 = vmatprep.subr.bf16.mxu0 %v469_v4  ;;  %v473_v12 = vpack.c.bf16 %v138_v9, %v136_v6  ;;  %v140_v14 = vld [vmem:[#allocation2 + $0x28] sm:$0xff]  ;;  %v142_v15 = vld [vmem:[#allocation2 + $0x38] sm:$0xff] }
  0x17   :  { %v475_v13 = vpack.c.bf16 %v137_v11, %v135_v10  ;;  %v139_v16 = vld [vmem:[#allocation2 + $0x20] sm:$0xff]  ;;  %472 = vmatpush1.bf16.msra.mxu0 %v471_v7  ;;  %v477_v17 = vpack.c.bf16 %v142_v15, %v140_v14  ;;  %v141_v18 = vld [vmem:[#allocation2 + $0x30] sm:$0xff]  ;;  %v144_v19 = vld [vmem:[#allocation2 + $0x48] sm:$0xff] }
  0x18   :  { %v146_v20 = vld [vmem:[#allocation2 + $0x58] sm:$0xff]  ;;  %474 = vmatprep.subr.bf16.mxu1 %v473_v12  ;;  %v479_v21 = vpack.c.bf16 %v141_v18, %v139_v16  ;;  %v143_v23 = vld [vmem:[#allocation2 + $0x40] sm:$0xff]  ;;  %v145_v24 = vld [vmem:[#allocation2 + $0x50] sm:$0xff] }
  0x19   :  { %476 = vmatpush1.bf16.msra.mxu1 %v475_v13  ;;  %v481_v22 = vpack.c.bf16 %v146_v20, %v144_v19  ;;  %v148_v25 = vld [vmem:[#allocation2 + $0x68] sm:$0xff]  ;;  %v150_v26 = vld [vmem:[#allocation2 + $0x78] sm:$0xff]  ;;  %v483_v27 = vpack.c.bf16 %v145_v24, %v143_v23  ;;  %v147_v29 = vld [vmem:[#allocation2 + $0x60] sm:$0xff] }
  0x1a   :  { %432 = vmatmul.mubr.msk.f32.vlgmr.msra.gmra.mrb[0].mxu0 %vm58_vm0, %v701_v8  ;;  %478 = vmatprep.subr.bf16.mxu1 %v477_v17  ;;  %v485_v28 = vpack.c.bf16 %v150_v26, %v148_v25  ;;  %v149_v30 = vld [vmem:[#allocation2 + $0x70] sm:$0xff]  ;;  %v152_v31 = vld [vmem:[#allocation2 + $0x88] sm:$0xff]  ;;  %v154_v32 = vld [vmem:[#allocation2 + $0x98] sm:$0xff] }
  0x1b   :  { %v487_v33 = vpack.c.bf16 %v149_v30, %v147_v29  ;;  %v489_v34 = vpack.c.bf16 %v154_v32, %v152_v31  ;;  %v151_v35 = vld [vmem:[#allocation2 + $0x80] sm:$0xff]  ;;  %v153_v36 = vld [vmem:[#allocation2 + $0x90] sm:$0xff]  ;;  %v156_v37 = vld [vmem:[#allocation2 + $0xa8] sm:$0xff] }
  0x1c   :  { %v158_v38 = vld [vmem:[#allocation2 + $0xb8] sm:$0xff]  ;;  %v491_v39 = vpack.c.bf16 %v153_v36, %v151_v35  ;;  %v155_v41 = vld [vmem:[#allocation2 + $0xa0] sm:$0xff]  ;;  %v157_v42 = vld [vmem:[#allocation2 + $0xb0] sm:$0xff] }
  0x1d   :  { %480 = vmatpush1.bf16.msra.mxu1 %v479_v21  ;;  %v493_v40 = vpack.c.bf16 %v158_v38, %v156_v37  ;;  %v160_v43 = vld [vmem:[#allocation2 + $0xc8] sm:$0xff]  ;;  %v162_v44 = vld [vmem:[#allocation2 + $0xd8] sm:$0xff]  ;;  %v495_v45 = vpack.c.bf16 %v157_v42, %v155_v41  ;;  %v159_v47 = vld [vmem:[#allocation2 + $0xc0] sm:$0xff] }
  0x1e   :  { %482 = vmatprep.subr.bf16.mxu1 %v481_v22  ;;  %v497_v46 = vpack.c.bf16 %v162_v44, %v160_v43  ;;  %v161_v48 = vld [vmem:[#allocation2 + $0xd0] sm:$0xff]  ;;  %v164_v49 = vld [vmem:[#allocation2 + $0xe8] sm:$0xff]  ;;  %v166_v50 = vld [vmem:[#allocation2 + $0xf8] sm:$0xff] }
  0x1f   :  { %v499_v51 = vpack.c.bf16 %v161_v48, %v159_v47  ;;  %v501_v52 = vpack.c.bf16 %v166_v50, %v164_v49  ;;  %v163_v53 = vld [vmem:[#allocation2 + $0xe0] sm:$0xff]  ;;  %v165_v54 = vld [vmem:[#allocation2 + $0xf0] sm:$0xff]  ;;  %v168_v55 = vld [vmem:[#allocation2 + $0x108] sm:$0xff] }
  0x20   :  { %v170_v56 = vld [vmem:[#allocation2 + $0x118] sm:$0xff]  ;;  %v503_v57 = vpack.c.bf16 %v165_v54, %v163_v53  ;;  %v167_v59 = vld [vmem:[#allocation2 + $0x100] sm:$0xff]  ;;  %v169_v60 = vld [vmem:[#allocation2 + $0x110] sm:$0xff] }
  0x21   :  { %484 = vmatpush1.bf16.msra.mxu1 %v483_v27  ;;  %v505_v58 = vpack.c.bf16 %v170_v56, %v168_v55  ;;  %v172_v61 = vld [vmem:[#allocation2 + $0x128] sm:$0xff]  ;;  %v174_v62 = vld [vmem:[#allocation2 + $0x138] sm:$0xff]  ;;  %v507_v63 = vpack.c.bf16 %v169_v60, %v167_v59  ;;  %v171_v1 = vld [vmem:[#allocation2 + $0x120] sm:$0xff] }
  0x22   :  { %486 = vmatprep.subr.bf16.mxu1 %v485_v28  ;;  %v509_v0 = vpack.c.bf16 %v174_v62, %v172_v61  ;;  %v173_v2 = vld [vmem:[#allocation2 + $0x130] sm:$0xff]  ;;  %v176_v3 = vld [vmem:[#allocation2 + $0x148] sm:$0xff]  ;;  %v178_v4 = vld [vmem:[#allocation2 + $0x158] sm:$0xff] }
  0x23   :  { %v511_v5 = vpack.c.bf16 %v173_v2, %v171_v1  ;;  %v513_v6 = vpack.c.bf16 %v178_v4, %v176_v3  ;;  %v175_v7 = vld [vmem:[#allocation2 + $0x140] sm:$0xff]  ;;  %v177_v9 = vld [vmem:[#allocation2 + $0x150] sm:$0xff]  ;;  %v180_v10 = vld [vmem:[#allocation2 + $0x168] sm:$0xff] }
  0x24   :  { %v182_v11 = vld [vmem:[#allocation2 + $0x178] sm:$0xff]  ;;  %v515_v12 = vpack.c.bf16 %v177_v9, %v175_v7  ;;  %v179_v14 = vld [vmem:[#allocation2 + $0x160] sm:$0xff]  ;;  %v181_v15 = vld [vmem:[#allocation2 + $0x170] sm:$0xff] }
  0x25   :  { %488 = vmatpush1.bf16.msra.mxu1 %v487_v33  ;;  %v517_v13 = vpack.c.bf16 %v182_v11, %v180_v10  ;;  %v184_v16 = vld [vmem:[#allocation2 + $0x188] sm:$0xff]  ;;  %v186_v17 = vld [vmem:[#allocation2 + $0x198] sm:$0xff]  ;;  %v519_v18 = vpack.c.bf16 %v181_v15, %v179_v14  ;;  %v183_v20 = vld [vmem:[#allocation2 + $0x180] sm:$0xff] }
  0x26   :  { %490 = vmatprep.subr.bf16.mxu1 %v489_v34  ;;  %v521_v19 = vpack.c.bf16 %v186_v17, %v184_v16  ;;  %v185_v21 = vld [vmem:[#allocation2 + $0x190] sm:$0xff]  ;;  %v188_v22 = vld [vmem:[#allocation2 + $0x1a8] sm:$0xff]  ;;  %v190_v23 = vld [vmem:[#allocation2 + $0x1b8] sm:$0xff]  ;;  %v48_v17 = vlaneseq }
  0x27   :  { %v523_v24 = vpack.c.bf16 %v185_v21, %v183_v20  ;;  %v525_v25 = vpack.c.bf16 %v190_v23, %v188_v22  ;;  %v187_v26 = vld [vmem:[#allocation2 + $0x1a0] sm:$0xff]  ;;  %v189_v27 = vld [vmem:[#allocation2 + $0x1b0] sm:$0xff]  ;;  %v192_v28 = vld [vmem:[#allocation2 + $0x1c8] sm:$0xff] }
  0x28   :  { %v194_v29 = vld [vmem:[#allocation2 + $0x1d8] sm:$0xff]  ;;  %v527_v30 = vpack.c.bf16 %v189_v27, %v187_v26  ;;  %v191_v32 = vld [vmem:[#allocation2 + $0x1c0] sm:$0xff]  ;;  %v193_v33 = vld [vmem:[#allocation2 + $0x1d0] sm:$0xff] }
  0x29   :  { %492 = vmatpush1.bf16.msra.mxu1 %v491_v39  ;;  %v529_v31 = vpack.c.bf16 %v194_v29, %v192_v28  ;;  %v531_v34 = vpack.c.bf16 %v193_v33, %v191_v32  ;;  %v196_v35 = vld [vmem:[#allocation2 + $0x1e8] sm:$0xff]  ;;  %v198_v36 = vld [vmem:[#allocation2 + $0x1f8] sm:$0xff]  ;;  %v195_v38 = vld [vmem:[#allocation2 + $0x1e0] sm:$0xff] }
  0x2a   :  { %494 = vmatprep.subr.bf16.mxu1 %v493_v40  ;;  %v533_v37 = vpack.c.bf16 %v198_v36, %v196_v35  ;;  %v197_v39 = vld [vmem:[#allocation2 + $0x1f0] sm:$0xff]  ;;  %v300_v41 = vld [vmem:[%s829_s5 + $0x80] sm:$0xff]  ;;  %v301_v42 = vld [vmem:[%s829_s5 + $0x88] sm:$0xff] }
  0x2b   :  { %v535_v40 = vpack.c.bf16 %v197_v39, %v195_v38  ;;  %v284_v43 = vld [vmem:[%s829_s5] sm:$0xff]  ;;  %v537_v44 = vpack.c.bf16 %v301_v42, %v300_v41  ;;  %v303_v47 = vld [vmem:[%s829_s5 + $0x98] sm:$0xff]  ;;  %v286_v50 = vld [vmem:[%s829_s5 + $0x10] sm:$0xff] }
  0x2c   :  { %v305_v53 = vld [vmem:[%s829_s5 + $0xa8] sm:$0xff]  ;;  %v288_v56 = vld [vmem:[%s829_s5 + $0x20] sm:$0xff]  ;;  %v307_v59 = vld [vmem:[%s829_s5 + $0xb8] sm:$0xff] }
  0x2d   :  { %496 = vmatpush1.bf16.msra.mxu1 %v495_v45  ;;  %v285_v45 = vld [vmem:[%s829_s5 + $0x8] sm:$0xff]  ;;  %538 = vmatprep.subr.bf16.mxu0 %v537_v44  ;;  %v290_v62 = vld [vmem:[%s829_s5 + $0x30] sm:$0xff]  ;;  %v292_v4 = vld [vmem:[%s829_s5 + $0x40] sm:$0xff] }
  0x2e   :  { %498 = vmatprep.subr.bf16.mxu1 %v497_v46  ;;  %v302_v46 = vld [vmem:[%s829_s5 + $0x90] sm:$0xff]  ;;  %v539_v48 = vpack.c.bf16 %v285_v45, %v284_v43  ;;  %v309_v1 = vld [vmem:[%s829_s5 + $0xc8] sm:$0xff]  ;;  %v311_v7 = vld [vmem:[%s829_s5 + $0xd8] sm:$0xff] }
  0x2f   :  { %v541_v49 = vpack.c.bf16 %v303_v47, %v302_v46  ;;  %v294_v11 = vld [vmem:[%s829_s5 + $0x50] sm:$0xff]  ;;  %v313_v14 = vld [vmem:[%s829_s5 + $0xe8] sm:$0xff]  ;;  %v46_v20 = vld [vmem:[%s826_s2] sm:$0x3] }
  0x30   :  { %540 = vmatpush3.bf16.msra.mxu0 %v539_v48  ;;  %v314_v33 = vld [vmem:[%s829_s5 + $0xf0] sm:$0xff]  ;;  %v199_v39 = vld [vmem:[%s828_s4] sm:$0x3]  ;;  %s630_s4 = smov 8  }
  0x31   :  { %500 = vmatpush1.bf16.msra.mxu1 %v499_v51  ;;  %v287_v51 = vld [vmem:[%s829_s5 + $0x18] sm:$0xff]  ;;  %542 = vmatprep.subr.bf16.mxu0 %v541_v49  ;;  %v298_v36 = vld [vmem:[%s829_s5 + $0x70] sm:$0xff]  ;;  %v433_v49 = vld [vmem:[%s830_s6] ss:$0 sm:$0xff]  ;;  %s632_s6 = smov [#allocation5]  }
  0x32   :  { %502 = vmatprep.subr.bf16.mxu1 %v501_v52  ;;  %v304_v52 = vld [vmem:[%s829_s5 + $0xa0] sm:$0xff]  ;;  %v543_v54 = vpack.c.bf16 %v287_v51, %v286_v50  ;;  %s423_s19 = sshll.u32 %s632_s6, 4  ;;  %s424_s19 = int_to_ptr.vmem [resolvable:$true] %s423_s19 }
  0x33   :  { %v545_v55 = vpack.c.bf16 %v305_v53, %v304_v52  ;;  %s600_s20 = scalar_lea.vmem %s424_s19, 128  ;;  %p605_p9 = scmp.lt.s32.totalorder %s424_s19, %s424_s19 }
  0x34   :  { %544 = vmatpush3.bf16.msra.mxu0 %v543_v54  ;;  %p601_p8 = scmp.ne.s32.totalorder %s424_s19, %s600_s20  ;;  %p606_p10 = scmp.lt.s32.totalorder %s600_s20, %s600_s20 }
  0x35   :  { %504 = vmatpush1.bf16.msra.mxu1 %v503_v57  ;;  %v289_v57 = vld [vmem:[%s829_s5 + $0x28] sm:$0xff]  ;;  %546 = vmatprep.subr.bf16.mxu0 %v545_v55 }
  0x36   :  { %506 = vmatprep.subr.bf16.mxu1 %v505_v58  ;;  %v306_v58 = vld [vmem:[%s829_s5 + $0xb0] sm:$0xff]  ;;  %v547_v60 = vpack.c.bf16 %v289_v57, %v288_v56  ;;  %p607_p11 = por %p606_p10, %p605_p9 }
  0x37   :  { %v549_v61 = vpack.c.bf16 %v307_v59, %v306_v58 }
  0x38   :  { %548 = vmatpush3.bf16.msra.mxu0 %v547_v60  ;;  %p608_p12 = pnand %p607_p11, %p601_p8 }
  0x39   :  { %508 = vmatpush1.bf16.msra.mxu1 %v507_v63  ;;  %v291_v63 = vld [vmem:[%s829_s5 + $0x38] sm:$0xff]  ;;  %550 = vmatprep.subr.bf16.mxu0 %v549_v61 }
  0x3a   :  { %510 = vmatprep.subr.bf16.mxu1 %v509_v0  ;;  %v308_v0 = vld [vmem:[%s829_s5 + $0xc0] sm:$0xff]  ;;  %v551_v2 = vpack.c.bf16 %v291_v63, %v290_v62 }
  0x3b   :  { %v553_v3 = vpack.c.bf16 %v309_v1, %v308_v0 }
  0x3c   :  { %552 = vmatpush3.bf16.msra.mxu0 %v551_v2 }
  0x3d   :  { %512 = vmatpush1.bf16.msra.mxu1 %v511_v5  ;;  %v293_v5 = vld [vmem:[%s829_s5 + $0x48] sm:$0xff]  ;;  %554 = vmatprep.subr.bf16.mxu0 %v553_v3 }
  0x3e   :  { %514 = vmatprep.subr.bf16.mxu1 %v513_v6  ;;  %v310_v6 = vld [vmem:[%s829_s5 + $0xd0] sm:$0xff]  ;;  %v555_v9 = vpack.c.bf16 %v293_v5, %v292_v4 }
  0x3f   :  { %v557_v10 = vpack.c.bf16 %v311_v7, %v310_v6 }
  0x40   :  { %556 = vmatpush3.bf16.msra.mxu0 %v555_v9 }
  0x41   :  { %516 = vmatpush1.bf16.msra.mxu1 %v515_v12  ;;  %v295_v12 = vld [vmem:[%s829_s5 + $0x58] sm:$0xff]  ;;  %558 = vmatprep.subr.bf16.mxu0 %v557_v10 }
  0x42   :  { %518 = vmatprep.subr.bf16.mxu1 %v517_v13  ;;  %v312_v13 = vld [vmem:[%s829_s5 + $0xe0] sm:$0xff]  ;;  %v559_v15 = vpack.c.bf16 %v295_v12, %v294_v11 }
  0x43   :  { %v561_v16 = vpack.c.bf16 %v313_v14, %v312_v13 }
  0x44   :  { %560 = vmatpush3.bf16.msra.mxu0 %v559_v15 }
  0x45   :  { %520 = vmatpush1.bf16.msra.mxu1 %v519_v18  ;;  %562 = vmatprep.subr.bf16.mxu0 %v561_v16  ;;  %v49_v18 = vshrl.u32 %v48_v17, 7 }
  0x46   :  { %522 = vmatprep.subr.bf16.mxu1 %v521_v19 }
  0x47   :  { %v50_v19 = vsub.s32 0, %v49_v18  ;;  %v54_v21 = vsub.s32 1, %v49_v18 }
  0x49   :  { %524 = vmatpush1.bf16.msra.mxu1 %v523_v24  ;;  %v51_v22 = vrot.slane %v46_v20, %v50_v19  ;;  %v55_v23 = vrot.slane %v46_v20, %v54_v21  ;;  %v208_v41 = vrot.slane %v199_v39, %v54_v21 }
  0x4a   :  { %526 = vmatprep.subr.bf16.mxu1 %v525_v25 }
  0x4d   :  { %528 = vmatpush1.bf16.msra.mxu1 %v527_v30  ;;  %v296_v30 = vld [vmem:[%s829_s5 + $0x60] sm:$0xff] }
  0x4e   :  { %530 = vmatprep.subr.bf16.mxu1 %v529_v31  ;;  %v297_v31 = vld [vmem:[%s829_s5 + $0x68] sm:$0xff] }
  0x4f   :  { %v563_v32 = vpack.c.bf16 %v297_v31, %v296_v30 }
  0x51   :  { %532 = vmatpush1.bf16.msra.mxu1 %v531_v34  ;;  %564 = vmatpush3.bf16.msra.mxu0 %v563_v32  ;;  %v315_v34 = vld [vmem:[%s829_s5 + $0xf8] sm:$0xff] }
  0x52   :  { %534 = vmatprep.subr.bf16.mxu1 %v533_v37  ;;  %v565_v35 = vpack.c.bf16 %v315_v34, %v314_v33  ;;  %v299_v37 = vld [vmem:[%s829_s5 + $0x78] sm:$0xff] }
  0x53   :  { %v567_v38 = vpack.c.bf16 %v299_v37, %v298_v36 }
  0x54   :  { %566 = vmatprep.subr.bf16.mxu0 %v565_v35 }
  0x55   :  { %536 = vmatpush1.bf16.msra.mxu1 %v535_v40  ;;  %568 = vmatpush3.bf16.msra.mxu0 %v567_v38  ;;  %v204_v40 = vrot.slane %v199_v39, %v50_v19 }
  0xed   :  { %v128_v24 = vpop.f32.mrb[0].mxu0 }
  0xee   :  { %v129_v25 = vadd.f32 %v128_v24, %v51_v22  ;;  %v130_v26 = vpop.f32.mrb[1].mxu0 }
  0xef   :  { %v131_v27 = vadd.f32 %v130_v26, %v55_v23 }
  0xf0   :  { %v133_v29 = vmax.f32 %v129_v25, 0.0 }
  0xf1   :  { %v134_v28 = vmax.f32 %v131_v27, 0.0 }
  0xf3   :  { %275 = vmatprep.mubr.f32.mxu1 %v134_v28 }
  0xf4   :  { %276 = vmatmul.mubr.f32.vlgmr.msra.gmra.mrb[0].mxu1 %v133_v29 }
 0x1c7   :  { %v277_v42 = vpop.f32.mrb[0].mxu1 }
 0x1c8   :  { %v278_v43 = vadd.f32 %v277_v42, %v204_v40  ;;  %v279_v44 = vpop.f32.mrb[1].mxu1 }
 0x1c9   :  { %v280_v45 = vadd.f32 %v279_v44, %v208_v41 }
 0x1ca   :  { %v282_v47 = vmax.f32 %v278_v43, 0.0 }
 0x1cb   :  { %v283_v46 = vmax.f32 %v280_v45, 0.0 }
 0x1cd   :  { %387 = vmatprep.mubr.f32.mxu0 %v283_v46 }
 0x1ce   :  { %388 = vmatmul.mubr.f32.vlgmr.msra.gmra.mrb[2].mxu0 %v282_v47 }
 0x2a1   :  { %v466_v48 = vpop.f32.mrb[2].mxu0 }
 0x2a2   :  { %v467_v50 = vpop.f32.mrb[3].mxu0 }
 0x2a3   :  { %v468_v51 = vadd.f32 %v467_v50, %v466_v48 }
 0x2a5   :  { %v390_v52 = vadd.f32 %v468_v51, %v433_v49 }
 0x2a7   :  { %v394_v53 = vmul.f32 0.5, %v390_v52  ;;  %v393_v54 = vadd.f32 %v390_v52, %v701_v8 }
 0x2a9   :  { %v395_v55 = vmul.f32 1.442695, %v394_v53  ;;  %408 = vst.msk [vmem:[#allocation5] sm:$0xff] %vm407_vm1, %v393_v54 }
 0x2aa   :  { %410 = vst.msk [vmem:[#allocation5] sm:$0xff] %vm409_vm2, %v390_v52 }
 0x2ab   :  { %576 = vpow2.f32 %v395_v55 }
 0x2b5   :  { %v577_v56 = vpop.eup %576 }
 0x2b6   :  { %398 = vrot.lane.b32.xlu0 %v577_v56, %s630_s4 }
 0x328   :  { %v399_v57 = vpop.permute.xlu0 %398 }
 0x329   :  { %v401_v58 = vmul.f32 %v399_v57, %v701_v8 }
 0x32b   :  { %403 = vrot.lane.b32.xlu0 %v401_v58, %s631_s18 }
 0x39d   :  { %v404_v59 = vpop.permute.xlu0 %403 }
 0x39e   :  { %v406_v60 = vadd.f32 %v404_v59, %v393_v54 }
 0x3a0   :  { %412 = vrot.lane.b32.xlu1 %v406_v60, %s628_s12 }
 0x412   :  { %v413_v61 = vpop.permute.xlu1 %412 }
 0x413   :  { %416 = vst.msk [vmem:[#allocation5] sm:$0xff] %vm415_vm3, %v413_v61 }
 0x414   :  { %611 = shalt.err (!%p608_p12)
}
 0x415   :  { %s612_s3 = scalar_lea.hbm %s831_s7, 128 }
 0x416   :  { %p613_p13 = scmp.ne.s32.totalorder %s831_s7, %s612_s3  ;;  %p616_p0 = scmp.lt.u32.totalorder %s612_s3, %s831_s7 }
 0x418   :  { %p618_p1 = pnand %p616_p0, %p613_p13 }
 0x41a   :  { %621 = shalt.err (!%p618_p1)
}
 0x41b   :  { %426 = dma.vmem_to_hbm [thread:$0]  %s424_s19, 128, %s831_s7, [#allocation4]  }
 0x41c   :  { %624 = dma.done.wait [#allocation4], 128  }
 0x41d   :  { %625 = vsyncadd [#allocation4], 4294967168 }
 0x41e   :  { %430 = vsyncpa [#allocation3], 1 }
 0x41f   :  { %431 = vsyncpa [#allocation4], 1 }

</bundles_post_ra>
